<compile_context>
chip_gen: v7x
topology: tpu7x:2x2x1
jax: 0.10.0
libtpu: 0.0.40
codegen_flags: <defaults>
</compile_context>

<pallas_src>
import functools

import jax
import jax.numpy as jnp
from jax import lax
from jax.experimental import pallas as pl
from jax.experimental.pallas import tpu as pltpu

_LANE = 128
_SUBLANE = 8


def _round_up(x, m):
    return (x + m - 1) // m * m


def _vmem_budget_bytes():
    """(physical VMEM, budget): budget ~65% of physical (~41 MiB v7x, ~83 MiB v5e/v6e)."""
    phys = 64 * 1024 * 1024          # conservative default if the query fails
    try:
        phys = int(pltpu.get_tpu_info().vmem_capacity_bytes)
    except Exception:                 # pragma: no cover - keep portable
        pass
    return phys, max(32 * 1024 * 1024, int(phys * 0.65))


def _base_conv_kernel(x_ref, w_ref, shift_ref, o_ref, *, TH, K, act):
    """One (batch, cout-tile, h-tile) grid step.

    x_ref    : (H8+K-1, W8, KCp) bf16 kw-packed input slab for this batch elem
               (constant block index over inner grid axes -> stays resident,
               re-DMA'd only when the batch index changes).
    w_ref    : (K, KCp, Ct)      bf16 conv weights with BN scale folded in
    shift_ref: (1, Ct)           f32 folded BatchNorm shift
    o_ref    : (TH, W8, Ct)      output tile (bf16 by default)
    """
    W8 = o_ref.shape[1]
    Ct = o_ref.shape[2]
    KCp = x_ref.shape[2]
    h0 = pl.multiple_of(pl.program_id(2) * TH, _SUBLANE)   # TH is a multiple of 8

    # Clean chain of MXU dot-accumulates (no interleaved elementwise work) so
    # Mosaic can accumulate in the MXU result buffer on v7x.
    acc = jnp.zeros((TH * W8, Ct), jnp.float32)
    for kh in range(K):                         # K matmuls: kw taps live in KCp
        win = x_ref[pl.ds(h0 + kh, TH)]         # (TH, W8, KCp) row-granular slice
        acc = acc + jnp.dot(win.reshape(TH * W8, KCp), w_ref[kh],
                            preferred_element_type=jnp.float32)

    y = acc + shift_ref[...]                    # folded BatchNorm (eval) shift
    if act == 'silu':
        # exp and reciprocal both run on the EUP slot (no VPU divide).
        y = y * pl.reciprocal(1.0 + jnp.exp(-y), approx=True)
    elif act == 'relu':
        y = jnp.maximum(y, 0.0)
    elif act == 'lrelu':
        y = jnp.where(y >= 0.0, y, 0.1 * y)
    o_ref[...] = y.reshape(TH, W8, Ct).astype(o_ref.dtype)


def base_conv(x_nchw, conv_w, bn_gamma, bn_beta, bn_mean, bn_var, *,
              stride=1, groups=1, eps=1e-3, act='silu',
              out_dtype=jnp.bfloat16, h_tile=None, cout_tile=None):
    """Fused BaseConv forward: (N, Cin, H, W) -> (N, Cout, H, W) in `out_dtype`."""
    if act not in ('silu', 'relu', 'lrelu'):
        raise ValueError('Unsupported act type: {}'.format(act))
    N, Cin, H, W = x_nchw.shape
    Cout, Cin_w, K, K2 = conv_w.shape
    assert K == K2 and K % 2 == 1, "odd square kernels only"
    assert Cin_w == Cin
    assert stride == 1 and groups == 1, "only stride=1, groups=1 implemented"
    # TODO(synk): stride > 1 and grouped/depthwise convs need a strided-window /
    # block-diagonal-weight variant of this kernel.
    pad = (K - 1) // 2

    # ---- tile / padding geometry -------------------------------------------
    phys_vmem, budget = _vmem_budget_bytes()
    out_bytes = jnp.dtype(out_dtype).itemsize

    KC = K * Cin
    KCp = _round_up(max(KC, 1), _LANE)            # packed contraction depth
    # TODO(synk): for large Cin (K*Cin >> 256) keep the kw-tap loop instead of
    # packing (avoids the Kx input expansion), stream Cin over a trailing
    # "arbitrary" reduction grid axis with a VMEM f32 accumulator, and use an
    # overlapping pl.Element-style H block so only the halo tile is resident.

    if cout_tile is None:
        # 256-wide tiles match the v6e/v7x MXU N dim; pass 128 explicitly on v5e.
        cout_tile = _LANE if Cout <= _LANE else 2 * _LANE
    cout_tile = _round_up(cout_tile, _LANE)
    CopT = _round_up(Cout, cout_tile)
    n_co = CopT // cout_tile

    W8 = _round_up(W, _SUBLANE)                   # sublane-aligned output width
    H8_0 = _round_up(H, _SUBLANE)

    if h_tile is not None:
        TH = max(_SUBLANE, _round_up(h_tile, _SUBLANE))
    else:
        # Budget: 2x resident input slab + 2x weight tile (fixed) vs the
        # per-H-row cost of 2x output buffers + the f32 accumulator.
        in_bytes = 2 * (H8_0 + K - 1) * W8 * KCp * 2
        w_bytes = 2 * K * KCp * cout_tile * 2
        fixed = in_bytes + w_bytes + (1 << 20)                    # +1 MiB slack
        per_row = W8 * cout_tile * (2 * out_bytes + 4)
        avail = max(budget - fixed, _SUBLANE * per_row)
        TH = (avail // per_row) // _SUBLANE * _SUBLANE
        # Keep the f32 accumulator modest so it stays close to the vregs.
        acc_cap = ((1 << 20) // (W8 * cout_tile * 4)) // _SUBLANE * _SUBLANE
        TH = min(TH, max(_SUBLANE, acc_cap))
    TH = max(_SUBLANE, min(TH, H8_0))
    H8 = _round_up(H, TH)
    n_h = H8 // TH

    # ---- wrapper-side packing (transpose + pad + bf16 cast + kw im2col) -----
    # TODO(synk): in a real network keep activations NHWC + channel-padded
    # end-to-end so these HBM round trips (and the final slice/transpose) drop.
    x = jnp.transpose(x_nchw, (0, 2, 3, 1)).astype(jnp.bfloat16)          # (N,H,W,Cin)
    xpad = jnp.pad(x, ((0, 0), (pad, pad + H8 - H), (pad, pad + W8 - W), (0, 0)))
    packed = jnp.stack([xpad[:, :, kw:kw + W8, :] for kw in range(K)], axis=3)
    packed = packed.reshape(N, H8 + K - 1, W8, KC)
    if KCp > KC:
        packed = jnp.pad(packed, ((0, 0), (0, 0), (0, 0), (0, KCp - KC)))

    # ---- fold BatchNorm (eval semantics: running stats) into the weights ----
    inv_std = 1.0 / jnp.sqrt(bn_var + eps)
    scale = bn_gamma * inv_std                            # (Cout,)
    shift = bn_beta - bn_mean * scale                     # (Cout,)
    w = conv_w * scale[:, None, None, None]               # (Cout, Cin, K, K)
    w = jnp.transpose(w, (2, 3, 1, 0)).reshape(K, KC, Cout)   # [kh, kw*Cin+c, co]
    w = jnp.pad(w, ((0, 0), (0, KCp - KC), (0, CopT - Cout))).astype(jnp.bfloat16)
    shift_p = jnp.pad(shift, (0, CopT - Cout)).reshape(1, CopT).astype(jnp.float32)

    # ---- per-generation VMEM limit ------------------------------------------
    need = (2 * (H8 + K - 1) * W8 * KCp * 2 + 2 * K * KCp * cout_tile * 2 +
            TH * W8 * cout_tile * (2 * out_bytes + 4) + (2 << 20))
    vmem_limit = int(min(max(budget, need), int(phys_vmem * 0.9)))

    kernel = functools.partial(_base_conv_kernel, TH=TH, K=K, act=act)
    out_pad = pl.pallas_call(
        kernel,
        out_shape=jax.ShapeDtypeStruct((N, H8, W8, CopT), out_dtype),
        grid=(N, n_co, n_h),
        in_specs=[
            # Packed slab: constant block index over (co, th) -> resident in
            # VMEM, re-DMA'd only when the batch index changes.
            pl.BlockSpec((None, H8 + K - 1, W8, KCp), lambda n, co, th: (n, 0, 0, 0)),
            # TODO(synk): when n_co == 1 the weight index map is constant; a
            # pipeline_mode=pl.Buffered(1) here would save one weight buffer.
            pl.BlockSpec((K, KCp, cout_tile), lambda n, co, th: (0, 0, co)),
            pl.BlockSpec((1, cout_tile), lambda n, co, th: (0, co)),
        ],
        out_specs=pl.BlockSpec((None, TH, W8, cout_tile),
                               lambda n, co, th: (n, th, 0, co)),
        compiler_params=pltpu.CompilerParams(
            dimension_semantics=("parallel", "parallel", "arbitrary"),
            vmem_limit_bytes=vmem_limit),
    )(packed, w, shift_p)

    out = out_pad[:, :H, :W, :Cout]
    return jnp.transpose(out, (0, 3, 1, 2))


def _reference(x, w, gamma, beta, mean, var, eps, act):
    # Pure-JAX reference mimicking the PyTorch ops (NCHW, OIHW, eval-mode BN).
    pad = (w.shape[2] - 1) // 2
    y = lax.conv_general_dilated(
        x, w, window_strides=(1, 1), padding=((pad, pad), (pad, pad)),
        dimension_numbers=("NCHW", "OIHW", "NCHW"))
    y = (y - mean.reshape(1, -1, 1, 1)) / jnp.sqrt(var.reshape(1, -1, 1, 1) + eps)
    y = y * gamma.reshape(1, -1, 1, 1) + beta.reshape(1, -1, 1, 1)
    if act == 'silu':
        y = y * jax.nn.sigmoid(y)
    elif act == 'relu':
        y = jnp.maximum(y, 0.0)
    elif act == 'lrelu':
        y = jnp.where(y >= 0, y, 0.1 * y)
    return y


if __name__ == "__main__":
    # BaseConv(in_channels=4, out_channels=4, ksize=3, stride=1) defaults:
    # Conv2d(k=3, s=1, p=1, groups=1, bias=False) -> BatchNorm2d(eps=1e-3, eval) -> SiLU.
    N, Cin, H, W = 2, 4, 16, 16
    K = 3
    eps = 1e-3

    key = jax.random.PRNGKey(0)
    kx, kp1, kp2 = jax.random.split(key, 3)
    x = jax.random.normal(kx, (N, Cin, H, W), jnp.float32)

    def make_params(k, cout):
        ka, kb, kc, kd, ke = jax.random.split(k, 5)
        conv_w = jax.random.normal(ka, (cout, Cin, K, K), jnp.float32) * 0.1
        gamma = 1.0 + 0.1 * jax.random.normal(kb, (cout,), jnp.float32)
        beta = 0.1 * jax.random.normal(kc, (cout,), jnp.float32)
        mean = 0.1 * jax.random.normal(kd, (cout,), jnp.float32)
        var = jax.nn.softplus(jax.random.normal(ke, (cout,), jnp.float32)) + 0.5
        return conv_w, gamma, beta, mean, var

    # 1) BaseConv(4, 4, 3, 1): auto tiling (single H / Cout tile at this size).
    p4 = make_params(kp1, 4)
    out = base_conv(x, *p4, eps=eps, act='silu')
    out = jax.block_until_ready(out).astype(jnp.float32)
    ref = _reference(x, *p4, eps, 'silu')
    assert out.shape == (N, 4, H, W)
    err = float(jnp.max(jnp.abs(out - ref)))
    # bf16 MXU operands, bf16 output, f32 accumulation -> loosened tolerance.
    assert jnp.allclose(out, ref, atol=3e-2, rtol=3e-2), \
        f"mismatch vs reference (config 1), max abs err {err}"

    # 2) Wider head with forced tiling: exercises the Cout-tile and H-tile grid
    #    axes (grid = (2, 2, 2)) and the resident-slab reuse across them.
    p192 = make_params(kp2, 192)
    out2 = base_conv(x, *p192, eps=eps, act='silu', h_tile=8, cout_tile=128)
    out2 = jax.block_until_ready(out2).astype(jnp.float32)
    ref2 = _reference(x, *p192, eps, 'silu')
    assert out2.shape == (N, 192, H, W)
    err2 = float(jnp.max(jnp.abs(out2 - ref2)))
    assert jnp.allclose(out2, ref2, atol=3e-2, rtol=3e-2), \
        f"mismatch vs reference (config 2), max abs err {err2}"

    print("KERNEL_OK")
</pallas_src>

<mosaic_0001>
module attributes {stable_mosaic.version = 11 : i64} {
  func.func @_base_conv_kernel(%arg0: i32, %arg1: i32, %arg2: i32, %arg3: memref<1x18x16x128xbf16, #tpu.memory_space<vmem>>, %arg4: memref<3x128x128xbf16, #tpu.memory_space<vmem>>, %arg5: memref<1x128xf32, #tpu.memory_space<vmem>>, %arg6: memref<1x16x16x128xbf16, #tpu.memory_space<vmem>>) attributes {dimension_semantics = [#tpu.dimension_semantics<parallel>, #tpu.dimension_semantics<parallel>, #tpu.dimension_semantics<arbitrary>], iteration_bounds = array<i64: 2, 1, 1>, scalar_prefetch = 0 : i64, scratch_operands = 0 : i64, tpu.core_type = #tpu.core_type<tc>, window_params = [{transform_indices = @transform_0, window_bounds = array<i64: 1, 18, 16, 128>}, {transform_indices = @transform_1, window_bounds = array<i64: 3, 128, 128>}, {transform_indices = @transform_2, window_bounds = array<i64: 1, 128>}, {transform_indices = @transform_3, window_bounds = array<i64: 1, 16, 16, 128>}]} {
    %c16_i32 = arith.constant 16 : i32
    %0 = arith.muli %arg2, %c16_i32 : i32
    %1 = tpu.assume_multiple %0, 8 : i32
    %cst = arith.constant 0.000000e+00 : f32
    %2 = vector.broadcast %cst : f32 to vector<256x128xf32>
    %c0_i32 = arith.constant 0 : i32
    %3 = arith.addi %1, %c0_i32 : i32
    %c0 = arith.constant 0 : index
    %4 = arith.index_cast %3 : i32 to index
    %c0_0 = arith.constant 0 : index
    %c0_1 = arith.constant 0 : index
    %5 = vector.load %arg3[%c0, %4, %c0_0, %c0_1] : memref<1x18x16x128xbf16, #tpu.memory_space<vmem>>, vector<1x16x16x128xbf16>
    %6 = vector.shape_cast %5 : vector<1x16x16x128xbf16> to vector<16x16x128xbf16>
    %7 = vector.shape_cast %6 : vector<16x16x128xbf16> to vector<256x128xbf16>
    %c0_2 = arith.constant 0 : index
    %c0_3 = arith.constant 0 : index
    %c0_4 = arith.constant 0 : index
    %8 = vector.load %arg4[%c0_2, %c0_3, %c0_4] : memref<3x128x128xbf16, #tpu.memory_space<vmem>>, vector<1x128x128xbf16>
    %9 = vector.shape_cast %8 : vector<1x128x128xbf16> to vector<128x128xbf16>
    %cst_5 = arith.constant dense<0.000000e+00> : vector<256x128xf32>
    %10 = tpu.matmul %7, %9, %cst_5 {dimension_numbers = #tpu.dot_dimension_numbers<[1], [0], [0], [1], [0, 0, 1, 1], [], []>} : vector<256x128xbf16>, vector<128x128xbf16>, vector<256x128xf32> -> vector<256x128xf32>
    %11 = arith.addf %2, %10 : vector<256x128xf32>
    %c1_i32 = arith.constant 1 : i32
    %12 = arith.addi %1, %c1_i32 : i32
    %c0_6 = arith.constant 0 : index
    %13 = arith.index_cast %12 : i32 to index
    %c0_7 = arith.constant 0 : index
    %c0_8 = arith.constant 0 : index
    %14 = vector.load %arg3[%c0_6, %13, %c0_7, %c0_8] : memref<1x18x16x128xbf16, #tpu.memory_space<vmem>>, vector<1x16x16x128xbf16>
    %15 = vector.shape_cast %14 : vector<1x16x16x128xbf16> to vector<16x16x128xbf16>
    %16 = vector.shape_cast %15 : vector<16x16x128xbf16> to vector<256x128xbf16>
    %c1 = arith.constant 1 : index
    %c0_9 = arith.constant 0 : index
    %c0_10 = arith.constant 0 : index
    %17 = vector.load %arg4[%c1, %c0_9, %c0_10] : memref<3x128x128xbf16, #tpu.memory_space<vmem>>, vector<1x128x128xbf16>
    %18 = vector.shape_cast %17 : vector<1x128x128xbf16> to vector<128x128xbf16>
    %cst_11 = arith.constant dense<0.000000e+00> : vector<256x128xf32>
    %19 = tpu.matmul %16, %18, %cst_11 {dimension_numbers = #tpu.dot_dimension_numbers<[1], [0], [0], [1], [0, 0, 1, 1], [], []>} : vector<256x128xbf16>, vector<128x128xbf16>, vector<256x128xf32> -> vector<256x128xf32>
    %20 = arith.addf %11, %19 : vector<256x128xf32>
    %c2_i32 = arith.constant 2 : i32
    %21 = arith.addi %1, %c2_i32 : i32
    %c0_12 = arith.constant 0 : index
    %22 = arith.index_cast %21 : i32 to index
    %c0_13 = arith.constant 0 : index
    %c0_14 = arith.constant 0 : index
    %23 = vector.load %arg3[%c0_12, %22, %c0_13, %c0_14] : memref<1x18x16x128xbf16, #tpu.memory_space<vmem>>, vector<1x16x16x128xbf16>
    %24 = vector.shape_cast %23 : vector<1x16x16x128xbf16> to vector<16x16x128xbf16>
    %25 = vector.shape_cast %24 : vector<16x16x128xbf16> to vector<256x128xbf16>
    %c2 = arith.constant 2 : index
    %c0_15 = arith.constant 0 : index
    %c0_16 = arith.constant 0 : index
    %26 = vector.load %arg4[%c2, %c0_15, %c0_16] : memref<3x128x128xbf16, #tpu.memory_space<vmem>>, vector<1x128x128xbf16>
    %27 = vector.shape_cast %26 : vector<1x128x128xbf16> to vector<128x128xbf16>
    %cst_17 = arith.constant dense<0.000000e+00> : vector<256x128xf32>
    %28 = tpu.matmul %25, %27, %cst_17 {dimension_numbers = #tpu.dot_dimension_numbers<[1], [0], [0], [1], [0, 0, 1, 1], [], []>} : vector<256x128xbf16>, vector<128x128xbf16>, vector<256x128xf32> -> vector<256x128xf32>
    %29 = arith.addf %20, %28 : vector<256x128xf32>
    %c0_18 = arith.constant 0 : index
    %c0_19 = arith.constant 0 : index
    %30 = vector.load %arg5[%c0_18, %c0_19] : memref<1x128xf32, #tpu.memory_space<vmem>>, vector<1x128xf32>
    %31 = vector.broadcast %30 : vector<1x128xf32> to vector<256x128xf32>
    %32 = arith.addf %29, %31 : vector<256x128xf32>
    %cst_20 = arith.constant 0.000000e+00 : f32
    %33 = vector.broadcast %cst_20 : f32 to vector<256x128xf32>
    %34 = arith.subf %33, %32 : vector<256x128xf32>
    %35 = math.exp %34 : vector<256x128xf32>
    %cst_21 = arith.constant 1.000000e+00 : f32
    %36 = vector.broadcast %cst_21 : f32 to vector<256x128xf32>
    %37 = arith.addf %36, %35 : vector<256x128xf32>
    %38 = tpu.reciprocal %37 {approx = true} : vector<256x128xf32> -> vector<256x128xf32>
    %39 = arith.mulf %32, %38 : vector<256x128xf32>
    %40 = vector.shape_cast %39 : vector<256x128xf32> to vector<16x16x128xf32>
    %41 = arith.truncf %40 : vector<16x16x128xf32> to vector<16x16x128xbf16>
    %c0_22 = arith.constant 0 : index
    %c0_23 = arith.constant 0 : index
    %c0_24 = arith.constant 0 : index
    %c0_25 = arith.constant 0 : index
    %42 = vector.load %arg6[%c0_22, %c0_23, %c0_24, %c0_25] : memref<1x16x16x128xbf16, #tpu.memory_space<vmem>>, vector<1x16x16x128xbf16>
    %43 = vector.shape_cast %42 : vector<1x16x16x128xbf16> to vector<16x16x128xbf16>
    %44 = vector.shape_cast %41 : vector<16x16x128xbf16> to vector<1x16x16x128xbf16>
    tpu.vector_store %arg6[%c0_22, %c0_23, %c0_24, %c0_25], %44 {strides = array<i32>} : memref<1x16x16x128xbf16, #tpu.memory_space<vmem>>, vector<1x16x16x128xbf16>,
    return
  }
  func.func @transform_0(%arg0: i32, %arg1: i32, %arg2: i32) -> (i32, i32, i32, i32) {
    %c0_i32 = arith.constant 0 : i32
    %c0_i32_0 = arith.constant 0 : i32
    %c0_i32_1 = arith.constant 0 : i32
    %c0_i32_2 = arith.constant 0 : i32
    return %arg0, %c0_i32, %c0_i32_0, %c0_i32_1 : i32, i32, i32, i32
  }
  func.func @transform_1(%arg0: i32, %arg1: i32, %arg2: i32) -> (i32, i32, i32) {
    %c0_i32 = arith.constant 0 : i32
    %c0_i32_0 = arith.constant 0 : i32
    %c0_i32_1 = arith.constant 0 : i32
    return %c0_i32, %c0_i32_0, %arg1 : i32, i32, i32
  }
  func.func @transform_2(%arg0: i32, %arg1: i32, %arg2: i32) -> (i32, i32) {
    %c0_i32 = arith.constant 0 : i32
    %c0_i32_0 = arith.constant 0 : i32
    return %c0_i32, %arg1 : i32, i32
  }
  func.func @transform_3(%arg0: i32, %arg1: i32, %arg2: i32) -> (i32, i32, i32, i32) {
    %c0_i32 = arith.constant 0 : i32
    %c0_i32_0 = arith.constant 0 : i32
    return %arg0, %arg2, %c0_i32, %arg1 : i32, i32, i32, i32
  }
}

</mosaic_0001>

<bundles_post_ra>
// kernel: tpu_custom_call.1
= control target key start
LH: loop header
LB: loop body
LE: loop exit
PB: predicated region body
PF: predicated region fallthrough
CT: control target
= control target key end

     0   :  { %8 = vsyncpa [#allocation3], 0  ;;  %s3460_s0 = inlined_call_operand.hbm [shape: bf16[2,18,16,128], index: 0, kind: input, shape index: {}]   ;;  %s3461_s1 = inlined_call_operand.hbm [shape: bf16[3,128,128], index: 1, kind: input, shape index: {}]   ;;  %s3462_s2 = inlined_call_operand.vmem [shape: f32[1,128], index: 2, kind: input, shape index: {}]   ;;  %s3463_s3 = inlined_call_operand.hbm [shape: bf16[2,16,16,128], index: 3, kind: output, shape index: {}]  }
   0x1   :  { %10 = vsyncpa [#allocation3 + $0x1], 0 }
   0x2   :  { %11 = vsyncpa [#allocation6], 0 }
   0x3   :  { %12 = vsyncpa [#allocation4], 0 }
   0x4   :  { %14 = vsyncpa [#allocation4 + $0x1], 0  ;;  %s2947_s12 = smov 0   ;;  %s2949_s13 = smov 0  }
   0x5   :  { %s2951_s14 = smov 0   ;;  %s2953_s15 = smov 0  }
   0x6   :  { %s2955_s16 = smov 0   ;;  %s2957_s17 = smov 0  }
   0x7 LB: > { %s1886_s18 = sadd.s32 4294967295, %s2918_s17   ;;  %s1887_s19 = sadd.s32 4294967294, %s2918_s17   ;;  %s2918_s17 = sphi %s2957_s17, %s20_s17   ;;  %s2914_s16 = sphi %s2955_s16, %s3486_s16   ;;  %s2910_s15 = sphi %s2953_s15, %s3485_s15   ;;  %s2906_s14 = sphi %s2951_s14, %s3484_s14   ;;  %s2902_s13 = sphi %s2949_s13, %s3483_s13   ;;  %s2898_s12 = sphi %s2947_s12, %s3482_s12  }
   0x8   : > { %p59_p0 = scmp.ne.s32.totalorder %s2902_s13, %s2898_s12  ;;  %p2981_p1 = scmp.eq.s32.totalorder %s1886_s18, 0 }
   0x9   : > { %p2985_p2 = scmp.eq.s32.totalorder %s1886_s18, 1  ;;  %p145_p3 = scmp.eq.s32.totalorder %s1887_s19, 1 }
   0xa   : > { %s3468_s20 = scalar_select %p2981_p1, 1, 0 }
   0xb   : > { %s3469_s21 = scalar_select %p2985_p2, 1, 0 }
   0xc   : > { %p2991_p4 = por %p2981_p1, %p59_p0  ;;  %p1888_p5 = scmp.ge.s32.totalorder %s2918_s17, 1 }
   0xd   : > { %p2996_p6 = por %p145_p3, %p59_p0  ;;  %p152_p7 = scmp.lt.s32.totalorder %s2918_s17, 3 }
   0xe   : > { %s3470_s22 = scalar_select %p2991_p4, 1, 0 }
   0xf   : > { %s3471_s23 = scalar_select %p2996_p6, 1, 0 }
  0x10   : > { %p3001_p8 = pnand %p1888_p5, %p152_p7  ;;  %s2920_s25 = smov [#allocation5]  }
  0x11   : > { %s166_s26 = sshll.u32 %s2920_s25, 4  ;;  %s39_s28 = sadd.s32 1, %s2914_s16  ;;  %s167_s26 = int_to_ptr.vmem [resolvable:$true] %s166_s26 }
  0x12   : > { %s3472_s24 = scalar_select %p3001_p8, 1, 0 }
  0x13   : > { %p2505_p9 = pneg %p3001_p8  ;;  %s2774_s4 = scalar_lea.hbm %s3461_s1, 3072 }
  0x14   : > { %p2775_p12 = scmp.ne.s32.totalorder %s3461_s1, %s2774_s4  ;;  %p2781_p5 = scmp.lt.u32.totalorder %s2774_s4, %s3461_s1 }
  0x15   : > { %p3010_p11 = pnand %p2505_p9, %p2981_p1 }
  0x17   : > { %p2776_p13 = pneg %p3010_p11 }
  0x19   : > { %p2777_p0 = pnand %p2776_p13, %p2775_p12 }
  0x1b   : > { %p2778_p3 = pneg %p2777_p0 }
  0x1d   : > { %p2783_p7 = pnand %p2781_p5, %p2778_p3 }
  0x1f   : > { %2786 = shalt.err (!%p2783_p7)
}
  0x20   : > { %s2787_s9 = scalar_lea.vmem %s167_s26, 3072  ;;  %p2795_p1 = scmp.lt.s32.totalorder %s167_s26, %s167_s26 }
  0x21   : > { %p2788_p9 = scmp.ne.s32.totalorder %s167_s26, %s2787_s9  ;;  %p2796_p4 = scmp.lt.s32.totalorder %s2787_s9, %s2787_s9 }
  0x23   : > { %p2790_p10 = pnand %p2788_p9, %p2776_p13  ;;  %p2797_p8 = por %p2796_p4, %p2795_p1 }
  0x25   : > { %p2791_p6 = pneg %p2790_p10 }
  0x27   : > { %p2798_p2 = pnand %p2797_p8, %p2791_p6 }
  0x29   : > { %2801 = shalt.err (!%p2798_p2)
}
  0x2a   : > { %s2921_s10 = smov 64   ;;  %s2922_s11 = smov 4  }
  0x2b   : > { %2508 = dma.hbm_to_vmem [thread:$0]  (!%p3010_p11), %s3461_s1, 3072, %s167_s26, [#allocation6], %s2921_s10, %s2921_s10, %s2922_s11  }
  0x2c   : > { %p41_p1 = scmp.ge.s32.totalorder %s39_s28, 2  ;;  %s46_s25 = sadd.s32 1, %s2906_s14 }
  0x2d   : > { %p53_p2 = scmp.ne.s32.totalorder %s2906_s14, %s2902_s13  ;;  %p54_p4 = scmp.eq.s32.totalorder %s2918_s17, 0 }
  0x2e   : > { %s3488_s28 = smov (%p41_p1, %s39_s28), 0  ;;  %p3474_p8 = scmp.ne.s32.totalorder %s3469_s21, 0 }
  0x2f   : > { %p55_p6 = por %p54_p4, %p53_p2  ;;  %s43_s27 = ssub.s32 %s2914_s16, %s3488_s28 }
  0x30   : > { %p3042_p10 = por %p3474_p8, %p53_p2  ;;  %p2518_p12 = scmp.lt.s32.totalorder %s2918_s17, 2 }
  0x31   : > { %p44_p13 = scmp.eq.s32.totalorder %s43_s27, 0  ;;  %s186_s30 = sand.u32 1, %s2906_s14  }
  0x32   : > { %s2494_s4 = smul.u32 144, %s186_s30  ;;  %p3054_p11 = pnand %p2518_p12, %p55_p6 }
  0x33   : > { %s3051_s5 = scalar_select %p44_p13, %s2906_s14, %s46_s25  }
  0x34   : > { %s2495_s26 = smul.u32 2304, %s2914_s16  ;;  %s190_s6 = scalar_lea.vmem [#allocation2], %s2494_s4 }
  0x35   : > { %s197_s7 = sshll.u32 %s190_s6, 4  ;;  %s3065_s19 = scalar_lea.sflag [#allocation3], %s186_s30  ;;  %s3063_s7 = int_to_ptr.vmem [resolvable:$true] %s197_s7 }
  0x36   : > { %s3061_s18 = scalar_lea.hbm %s3460_s0, %s2495_s26  ;;  %p2804_p3 = pneg %p3054_p11 }
  0x37   : > { %s2802_s25 = scalar_lea.hbm %s3061_s18, 2304  ;;  %s2807_s26 = scalar_lea.hbm %s3460_s0, 4608 }
  0x38   : > { %p2803_p0 = scmp.ne.s32.totalorder %s3061_s18, %s2802_s25  ;;  %p2808_p9 = scmp.lt.u32.totalorder %s3061_s18, %s3460_s0 }
  0x39   : > { %p2809_p1 = scmp.lt.u32.totalorder %s2807_s26, %s2802_s25  ;;  %p2811_p4 = scmp.lt.u32.totalorder %s2802_s25, %s3061_s18 }
  0x3a   : > { %p2805_p5 = pnand %p2804_p3, %p2803_p0 }
  0x3b   : > { %p2810_p2 = por %p2809_p1, %p2808_p9 }
  0x3c   : > { %p2806_p7 = pneg %p2805_p5 }
  0x3d   : > { %p2812_p6 = por %p2811_p4, %p2810_p2 }
  0x3f   : > { %p2813_p8 = pnand %p2812_p6, %p2806_p7 }
  0x41   : > { %2816 = shalt.err (!%p2813_p8)
}
  0x42   : > { %s2817_s30 = scalar_lea.vmem %s3063_s7, 2304  ;;  %s2923_s21 = smov [#allocation2]  }
  0x43   : > { %p2818_p12 = scmp.ne.s32.totalorder %s3063_s7, %s2817_s30  ;;  %s2822_s27 = sshll.u32 %s2923_s21, 4  ;;  %s2823_s27 = int_to_ptr.vmem [resolvable:$false] %s2822_s27 }
  0x44   : > { %s2824_s4 = scalar_lea.vmem %s2823_s27, 4608  ;;  %p2825_p5 = scmp.lt.s32.totalorder %s3063_s7, %s2823_s27 }
  0x45   : > { %p2820_p13 = pnand %p2818_p12, %p2804_p3  ;;  %p2826_p9 = scmp.lt.s32.totalorder %s2824_s4, %s2817_s30 }
  0x47   : > { %p2821_p0 = pneg %p2820_p13  ;;  %p2827_p1 = por %p2826_p9, %p2825_p5 }
  0x49   : > { %p2828_p2 = pnand %p2827_p1, %p2821_p0 }
  0x4b   : > { %2831 = shalt.err (!%p2828_p2)
}
  0x4c   : > { %2512 = dma.hbm_to_vmem [thread:$0]  (!%p3054_p11), %s3061_s18, 2304, %s3063_s7, %s3065_s19, %s2921_s10, %s2921_s10, %s2922_s11  }
  0x4d   : > { %p3477_p3 = scmp.ne.s32.totalorder %s3472_s24, 0 }
  0x4e   : > { %s3099_s25 = sand.u32 (!%p3477_p3), 1, %s2902_s13   ;;  %p3478_p7 = scmp.ne.s32.totalorder (!%p3477_p3), %s3470_s22, 0 }
  0x4f   : > { %209 = sbr.rel (%p3477_p3) target bundleno = 489 (0x1e9), region = 32  ;;  %s212_s6 = scalar_lea.sflag (!%p3477_p3), [#allocation3], %s3099_s25 }
  0x50   : > { %s2496_s26 = smul.u32 (!%p3477_p3), 144, %s3099_s25 }
  0x52   : > { %s3103_s9 = scalar_lea.vmem (!%p3477_p3), [#allocation2], %s2496_s26 }
  0x56   : > { %2885 = dma.done.wait (%p3478_p7), %s212_s6, 2304  }
  0x57   : > { %2887 = vsyncadd (%p3478_p7), %s212_s6, 4294964992  ;;  %p3479_p11 = scmp.ne.s32.totalorder %s3468_s20, 0 }
  0x59   : > { %2889 = dma.done.wait (%p3479_p11), [#allocation6], 3072  }
  0x5a   : > { %2891 = vsyncadd (%p3479_p11), [#allocation6], 4294964224  ;;  %v2574_v0 = vld [vmem:[#allocation5 + $0x40] sm:$0xff]   ;;  %v2576_v2 = vld [vmem:[#allocation5 + $0x48] sm:$0xff]   ;;  %s1895_s24 = sshll.u32 %s3099_s25, 7  ;;  %s2102_s11 = sshll.u32 %s2910_s15, 11 }
  0x5b   : > { %v2575_v1 = vld [vmem:[#allocation5] sm:$0xff]   ;;  %2270 = vmatprep.subr.bf16.mxu1 %v2574_v0  ;;  %v3113_v3 = vld [vmem:[#allocation5 + $0x8] sm:$0xff]   ;;  %v2578_v4 = vld [vmem:[#allocation5 + $0x50] sm:$0xff]   ;;  %s3305_s10 = scalar_lea.vmem [#allocation7], %s1895_s24  ;;  %s3408_s19 = scalar_lea.hbm %s3463_s3, %s2102_s11 }
  0x5c   : > { %2318 = vmatprep.subr.bf16.mxu0 %v2575_v1  ;;  %2271 = vmatpush3.bf16.msra.mxu1 %v2574_v0  ;;  %v3116_v5 = vld [vmem:[#allocation5 + $0x10] sm:$0xff]   ;;  %v2580_v6 = vld [vmem:[#allocation5 + $0x58] sm:$0xff]   ;;  %v2582_v8 = vld [vmem:[#allocation5 + $0x60] sm:$0xff]   ;;  %s1764_s7 = sshll.u32 %s3305_s10, 4  ;;  %s1747_s30 = scalar_lea.sflag [#allocation4], %s3099_s25  ;;  %s3410_s7 = int_to_ptr.vmem [resolvable:$true] %s1764_s7 }
  0x5d   : > { %2319 = vmatpush3.bf16.msra.mxu0 %v2575_v1  ;;  %2272 = vmatprep.subr.bf16.mxu1 %v2576_v2  ;;  %v3120_v7 = vld [vmem:[#allocation5 + $0x18] sm:$0xff]   ;;  %v3124_v9 = vld [vmem:[#allocation5 + $0x20] sm:$0xff]   ;;  %v2584_v10 = vld [vmem:[#allocation5 + $0x68] sm:$0xff]   ;;  %s2832_s15 = scalar_lea.vmem %s3410_s7, 2048  ;;  %s2924_s21 = smov [#allocation7]  }
  0x5e   : > { %2320 = vmatprep.subr.bf16.mxu0 %v3113_v3  ;;  %v3126_v11 = vld [vmem:[#allocation5 + $0x28] sm:$0xff]   ;;  %v2591_v13 = vld [vmem:[%s3103_s9] sm:$0xff]   ;;  %v2588_v16 = vld [vmem:[#allocation5 + $0x78] sm:$0xff]   ;;  %p2833_p4 = scmp.ne.s32.totalorder %s3410_s7, %s2832_s15  ;;  %s2836_s27 = sshll.u32 %s2924_s21, 4  ;;  %s2837_s27 = int_to_ptr.vmem [resolvable:$false] %s2836_s27 }
  0x5f   : > { %v2590_v12 = vld [vmem:[%s3103_s9 + $0x8] sm:$0xff]   ;;  %2334 = vmatprep.mubr.bf16.mxu0 %v2591_v13  ;;  %v2586_v14 = vld [vmem:[#allocation5 + $0x70] sm:$0xff]   ;;  %v2594_v19 = vld [vmem:[#allocation5 + $0x80] sm:$0xff]   ;;  %s2838_s4 = scalar_lea.vmem %s2837_s27, 4096  ;;  %p2839_p12 = scmp.lt.s32.totalorder %s3410_s7, %s2837_s27 }
  0x60   : > { %2273 = vmatpush3.bf16.msra.mxu1 %v2576_v2  ;;  %2286 = vmatprep.mubr.bf16.mxu1 %v2590_v12  ;;  %v3134_v15 = vld [vmem:[#allocation5 + $0x30] sm:$0xff]   ;;  %v3138_v17 = vld [vmem:[#allocation5 + $0x38] sm:$0xff]   ;;  %v2595_v21 = vld [vmem:[#allocation5 + $0x88] sm:$0xff]   ;;  %p2834_p6 = pnand %p2833_p4, %p3042_p10  ;;  %p2840_p13 = scmp.lt.s32.totalorder %s2838_s4, %s2832_s15 }
  0x61   : > { %2321 = vmatpush3.bf16.msra.mxu0 %v3113_v3  ;;  %2274 = vmatprep.subr.bf16.mxu1 %v2578_v4  ;;  %v2592_v18 = vld [vmem:[%s3103_s9 + $0x10] sm:$0xff]   ;;  %v2593_v20 = vld [vmem:[%s3103_s9 + $0x8] sm:$0xff]   ;;  %v2596_v22 = vld [vmem:[%s3103_s9 + $0x18] sm:$0xff]  }
  0x62   : > { %2322 = vmatprep.subr.bf16.mxu0 %v3116_v5  ;;  %v2597_v23 = vld [vmem:[%s3103_s9 + $0x10] sm:$0xff]   ;;  %v2598_v24 = vld [vmem:[%s3103_s9 + $0x20] sm:$0xff]   ;;  %v2599_v26 = vld [vmem:[%s3103_s9 + $0x18] sm:$0xff]   ;;  %p2835_p8 = pneg %p2834_p6  ;;  %p2841_p0 = por %p2840_p13, %p2839_p12 }
  0x63   : > { %v2600_v25 = vld [vmem:[#allocation5 + $0x90] sm:$0xff]   ;;  %v2602_v27 = vld [vmem:[%s3103_s9 + $0x28] sm:$0xff]   ;;  %v2606_v31 = vld [vmem:[#allocation5 + $0xa0] sm:$0xff]  }
  0x64   : > { %2275 = vmatpush3.bf16.msra.mxu1 %v2578_v4  ;;  %v2603_v28 = vld [vmem:[%s3103_s9 + $0x20] sm:$0xff]   ;;  %v2601_v29 = vld [vmem:[#allocation5 + $0x98] sm:$0xff]   ;;  %v2604_v30 = vld [vmem:[%s3103_s9 + $0x30] sm:$0xff]   ;;  %p2842_p5 = pnand %p2841_p0, %p2835_p8 }
  0x65   : > { %2323 = vmatpush3.bf16.msra.mxu0 %v3116_v5  ;;  %2276 = vmatprep.subr.bf16.mxu1 %v2580_v6  ;;  %v2605_v32 = vld [vmem:[%s3103_s9 + $0x28] sm:$0xff]   ;;  %v2608_v33 = vld [vmem:[%s3103_s9 + $0x38] sm:$0xff]   ;;  %v2609_v34 = vld [vmem:[%s3103_s9 + $0x30] sm:$0xff]  }
  0x66   : > { %2324 = vmatprep.subr.bf16.mxu0 %v3120_v7  ;;  %v2607_v35 = vld [vmem:[#allocation5 + $0xa8] sm:$0xff]   ;;  %v2610_v36 = vld [vmem:[%s3103_s9 + $0x40] sm:$0xff]   ;;  %v2615_v40 = vld [vmem:[%s3103_s9 + $0x10] sm:$0xff]  }
  0x67   : > { %v2612_v37 = vld [vmem:[#allocation5 + $0xb0] sm:$0xff]   ;;  %v2611_v38 = vld [vmem:[%s3103_s9 + $0x38] sm:$0xff]   ;;  %v2614_v39 = vld [vmem:[%s3103_s9 + $0x48] sm:$0xff]  }
  0x68   : > { %2277 = vmatpush3.bf16.msra.mxu1 %v2580_v6  ;;  %v2613_v41 = vld [vmem:[#allocation5 + $0xb8] sm:$0xff]   ;;  %v2616_v42 = vld [vmem:[%s3103_s9 + $0x50] sm:$0xff]   ;;  %v2619_v45 = vld [vmem:[%s3103_s9 + $0x20] sm:$0xff]  }
  0x69   : > { %2325 = vmatpush3.bf16.msra.mxu0 %v3120_v7  ;;  %2278 = vmatprep.subr.bf16.mxu1 %v2582_v8  ;;  %v2617_v43 = vld [vmem:[%s3103_s9 + $0x18] sm:$0xff]   ;;  %v2620_v46 = vld [vmem:[%s3103_s9 + $0x60] sm:$0xff]   ;;  %v2621_v47 = vld [vmem:[%s3103_s9 + $0x28] sm:$0xff]  }
  0x6a   : > { %2326 = vmatprep.subr.bf16.mxu0 %v3124_v9  ;;  %v2618_v44 = vld [vmem:[%s3103_s9 + $0x58] sm:$0xff]   ;;  %v2622_v48 = vld [vmem:[%s3103_s9 + $0x68] sm:$0xff]   ;;  %v2623_v49 = vld [vmem:[%s3103_s9 + $0x30] sm:$0xff]  }
  0x6b   : > { %v2624_v50 = vld [vmem:[%s3103_s9 + $0x70] sm:$0xff]   ;;  %v2625_v51 = vld [vmem:[%s3103_s9 + $0x38] sm:$0xff]   ;;  %v2627_v53 = vld [vmem:[%s3103_s9 + $0x40] sm:$0xff]  }
  0x6c   : > { %2279 = vmatpush3.bf16.msra.mxu1 %v2582_v8  ;;  %v2626_v52 = vld [vmem:[%s3103_s9 + $0x78] sm:$0xff]   ;;  %v2628_v54 = vld [vmem:[%s3103_s9 + $0x80] sm:$0xff]   ;;  %v2629_v55 = vld [vmem:[%s3103_s9 + $0x48] sm:$0xff]  }
  0x6d   : > { %2327 = vmatpush3.bf16.msra.mxu0 %v3124_v9  ;;  %2280 = vmatprep.subr.bf16.mxu1 %v2584_v10  ;;  %v2630_v56 = vld [vmem:[%s3103_s9 + $0x40] sm:$0xff]   ;;  %v2631_v57 = vld [vmem:[%s3103_s9 + $0x50] sm:$0xff]   ;;  %v2632_v58 = vld [vmem:[%s3103_s9 + $0x48] sm:$0xff]  }
  0x6e   : > { %2328 = vmatprep.subr.bf16.mxu0 %v3126_v11  ;;  %v2633_v59 = vld [vmem:[%s3103_s9 + $0x58] sm:$0xff]   ;;  %v2634_v60 = vld [vmem:[%s3103_s9 + $0x50] sm:$0xff]   ;;  %v2635_v61 = vld [vmem:[%s3103_s9 + $0x60] sm:$0xff]  }
  0x6f   : > { %v2636_v62 = vld [vmem:[%s3103_s9 + $0x58] sm:$0xff]   ;;  %v2637_v63 = vld [vmem:[%s3103_s9 + $0x68] sm:$0xff]   ;;  %v2638_v0 = vld [vmem:[%s3103_s9 + $0x60] sm:$0xff]  }
  0x70   : > { %2281 = vmatpush3.bf16.msra.mxu1 %v2584_v10  ;;  %v2640_v2 = vld [vmem:[%s3103_s9 + $0x68] sm:$0xff]   ;;  %v2642_v4 = vld [vmem:[%s3103_s9 + $0x70] sm:$0xff]   ;;  %v2644_v6 = vld [vmem:[%s3103_s9 + $0x78] sm:$0xff]  }
  0x71   : > { %2329 = vmatpush3.bf16.msra.mxu0 %v3126_v11  ;;  %2282 = vmatprep.subr.bf16.mxu1 %v2586_v14 }
  0x72   : > { %2330 = vmatprep.subr.bf16.mxu0 %v3134_v15 }
  0x74   : > { %2283 = vmatpush3.bf16.msra.mxu1 %v2586_v14 }
  0x75   : > { %2331 = vmatpush3.bf16.msra.mxu0 %v3134_v15  ;;  %2284 = vmatprep.subr.bf16.mxu1 %v2588_v16 }
  0x76   : > { %2332 = vmatprep.subr.bf16.mxu0 %v3138_v17 }
  0x78   : > { %2285 = vmatpush3.bf16.msra.mxu1 %v2588_v16 }
  0x79   : > { %2333 = vmatpush3.bf16.msra.mxu0 %v3138_v17  ;;  %2414 = vmatprep.subr.bf16.mxu1 %v2575_v1 }
  0x7a   : > { %2366 = vmatprep.subr.bf16.mxu0 %v2594_v19 }
  0x7b   : > { %2287 = vmatmul.mubr.bf16.vlgmr.msra.gmra.mrb[0].mxu1 %v2592_v18 }
  0x7c   : > { %2335 = vmatmul.mubr.bf16.vlgmr.msra.gmra.mrb[0].mxu0 %v2593_v20  ;;  %2422 = vmatpush3.bf16.msra.mxu1 %v2575_v1  ;;  %v2639_v1 = vld [vmem:[%s3103_s9 + $0x70] sm:$0xff]  }
  0x7d   : > { %2367 = vmatpush3.bf16.msra.mxu0 %v2594_v19  ;;  %2290 = vmatprep.mubr.bf16.mxu1 %v2596_v22 }
  0x7e   : > { %2368 = vmatprep.subr.bf16.mxu0 %v2595_v21  ;;  %2338 = vmatprep.mubr.bf16.mxu0 %v2597_v23 }
  0x7f   : > { %2415 = vmatprep.subr.bf16.mxu1 %v3113_v3 }
  0x80   : > { %2423 = vmatpush3.bf16.msra.mxu1 %v3113_v3  ;;  %v2641_v3 = vld [vmem:[%s3103_s9 + $0x78] sm:$0xff]  }
  0x81   : > { %2369 = vmatpush3.bf16.msra.mxu0 %v2595_v21  ;;  %2416 = vmatprep.subr.bf16.mxu1 %v3116_v5 }
  0x82   : > { %2370 = vmatprep.subr.bf16.mxu0 %v2600_v25 }
  0x83   : > { %2291 = vmatmul.mubr.bf16.gmra.mrb[4].mxu1 %v2598_v24 }
  0x84   : > { %2339 = vmatmul.mubr.bf16.gmra.mrb[4].mxu0 %v2599_v26  ;;  %2294 = vmatprep.mubr.bf16.mxu1 %v2602_v27 }
  0x85   : > { %2371 = vmatpush3.bf16.msra.mxu0 %v2600_v25  ;;  %2342 = vmatprep.mubr.bf16.mxu0 %v2603_v28  ;;  %v3216_v25 = vld [vmem:[%s3462_s2] ss:$0 sm:$0xff] }
  0x86   : > { %2372 = vmatprep.subr.bf16.mxu0 %v2601_v29  ;;  %2424 = vmatpush3.bf16.msra.mxu1 %v3116_v5  ;;  %v2643_v5 = vld [vmem:[%s3103_s9 + $0x80] sm:$0xff]  }
  0x87   : > { %2417 = vmatprep.subr.bf16.mxu1 %v3120_v7 }
  0x89   : > { %2373 = vmatpush3.bf16.msra.mxu0 %v2601_v29 }
  0x8a   : > { %2374 = vmatprep.subr.bf16.mxu0 %v2606_v31  ;;  %2425 = vmatpush3.bf16.msra.mxu1 %v3120_v7  ;;  %v2645_v7 = vld [vmem:[%s3103_s9 + $0x88] sm:$0xff]  }
  0x8b   : > { %2295 = vmatmul.mubr.bf16.gmra.mrb[8].mxu1 %v2604_v30  ;;  %2418 = vmatprep.subr.bf16.mxu1 %v3124_v9 }
  0x8c   : > { %2343 = vmatmul.mubr.bf16.gmra.mrb[8].mxu0 %v2605_v32  ;;  %2298 = vmatprep.mubr.bf16.mxu1 %v2608_v33 }
  0x8d   : > { %2375 = vmatpush3.bf16.msra.mxu0 %v2606_v31  ;;  %2346 = vmatprep.mubr.bf16.mxu0 %v2609_v34 }
  0x8e   : > { %2376 = vmatprep.subr.bf16.mxu0 %v2607_v35  ;;  %2426 = vmatpush3.bf16.msra.mxu1 %v3124_v9 }
  0x8f   : > { %2419 = vmatprep.subr.bf16.mxu1 %v3126_v11 }
  0x91   : > { %2377 = vmatpush3.bf16.msra.mxu0 %v2607_v35 }
  0x92   : > { %2378 = vmatprep.subr.bf16.mxu0 %v2612_v37  ;;  %2427 = vmatpush3.bf16.msra.mxu1 %v3126_v11 }
  0x93   : > { %2299 = vmatmul.mubr.bf16.gmra.mrb[12].mxu1 %v2610_v36  ;;  %2420 = vmatprep.subr.bf16.mxu1 %v3134_v15 }
  0x94   : > { %2347 = vmatmul.mubr.bf16.gmra.mrb[12].mxu0 %v2611_v38  ;;  %2302 = vmatprep.mubr.bf16.mxu1 %v2614_v39 }
  0x95   : > { %2379 = vmatpush3.bf16.msra.mxu0 %v2612_v37  ;;  %2382 = vmatprep.mubr.bf16.mxu0 %v2615_v40 }
  0x96   : > { %2380 = vmatprep.subr.bf16.mxu0 %v2613_v41  ;;  %2428 = vmatpush3.bf16.msra.mxu1 %v3134_v15 }
  0x97   : > { %2421 = vmatprep.subr.bf16.mxu1 %v3138_v17 }
  0x99   : > { %2381 = vmatpush3.bf16.msra.mxu0 %v2613_v41 }
  0x9a   : > { %2429 = vmatpush3.bf16.msra.mxu1 %v3138_v17 }
  0x9b   : > { %2303 = vmatmul.mubr.bf16.gmra.mrb[16].mxu1 %v2616_v42 }
  0x9c   : > { %2383 = vmatmul.mubr.bf16.vlgmr.msra.gmra.mrb[0].mxu0 %v2617_v43  ;;  %2306 = vmatprep.mubr.bf16.mxu1 %v2618_v44 }
  0x9d   : > { %2386 = vmatprep.mubr.bf16.mxu0 %v2619_v45 }
  0xa3   : > { %2307 = vmatmul.mubr.bf16.gmra.mrb[20].mxu1 %v2620_v46 }
  0xa4   : > { %2387 = vmatmul.mubr.bf16.gmra.mrb[4].mxu0 %v2621_v47  ;;  %2310 = vmatprep.mubr.bf16.mxu1 %v2622_v48 }
  0xa5   : > { %2390 = vmatprep.mubr.bf16.mxu0 %v2623_v49 }
  0xab   : > { %2311 = vmatmul.mubr.bf16.gmra.mrb[24].mxu1 %v2624_v50 }
  0xac   : > { %2391 = vmatmul.mubr.bf16.gmra.mrb[8].mxu0 %v2625_v51  ;;  %2314 = vmatprep.mubr.bf16.mxu1 %v2626_v52 }
  0xad   : > { %2394 = vmatprep.mubr.bf16.mxu0 %v2627_v53 }
  0xb3   : > { %2315 = vmatmul.mubr.bf16.gmra.mrb[28].mxu1 %v2628_v54 }
  0xb4   : > { %2395 = vmatmul.mubr.bf16.gmra.mrb[12].mxu0 %v2629_v55  ;;  %2350 = vmatprep.mubr.bf16.mxu1 %v2630_v56 }
  0xb5   : > { %2398 = vmatprep.mubr.bf16.mxu0 %v2631_v57 }
  0xbb   : > { %2351 = vmatmul.mubr.bf16.vlgmr.msra.gmra.mrb[16].mxu1 %v2632_v58 }
  0xbc   : > { %2399 = vmatmul.mubr.bf16.gmra.mrb[16].mxu0 %v2633_v59  ;;  %2354 = vmatprep.mubr.bf16.mxu1 %v2634_v60 }
  0xbd   : > { %2402 = vmatprep.mubr.bf16.mxu0 %v2635_v61 }
  0xc3   : > { %2355 = vmatmul.mubr.bf16.gmra.mrb[20].mxu1 %v2636_v62 }
  0xc4   : > { %2403 = vmatmul.mubr.bf16.gmra.mrb[20].mxu0 %v2637_v63  ;;  %2358 = vmatprep.mubr.bf16.mxu1 %v2638_v0 }
  0xc5   : > { %2406 = vmatprep.mubr.bf16.mxu0 %v2639_v1 }
  0xcb   : > { %2359 = vmatmul.mubr.bf16.gmra.mrb[24].mxu1 %v2640_v2 }
  0xcc   : > { %2407 = vmatmul.mubr.bf16.gmra.mrb[24].mxu0 %v2641_v3  ;;  %2362 = vmatprep.mubr.bf16.mxu1 %v2642_v4 }
  0xcd   : > { %2410 = vmatprep.mubr.bf16.mxu0 %v2643_v5 }
  0xd3   : > { %2363 = vmatmul.mubr.bf16.gmra.mrb[28].mxu1 %v2644_v6 }
  0xd4   : > { %2411 = vmatmul.mubr.bf16.gmra.mrb[28].mxu0 %v2645_v7 }
 0x14e   : > { %v2288_v8 = vpop.f32.mrb[0].mxu1 }
 0x14f   : > { %v533_v9 = vpop.f32.mrb[1].mxu1 }
 0x150   : > { %v2289_v10 = vpop.f32.mrb[2].mxu1 }
 0x151   : > { %v536_v11 = vpop.f32.mrb[3].mxu1 }
 0x156   : > { %v2292_v12 = vpop.f32.mrb[4].mxu1 }
 0x157   : > { %v549_v13 = vpop.f32.mrb[5].mxu1 }
 0x158   : > { %v2293_v14 = vpop.f32.mrb[6].mxu1 }
 0x159   : > { %v552_v15 = vpop.f32.mrb[7].mxu1 }
 0x15e   : > { %v2296_v16 = vpop.f32.mrb[8].mxu1 }
 0x15f   : > { %v565_v17 = vpop.f32.mrb[9].mxu1 }
 0x160   : > { %v2297_v18 = vpop.f32.mrb[10].mxu1 }
 0x161   : > { %v3203_v19 = vpop.f32.mrb[11].mxu1 }
 0x166   : > { %v3205_v20 = vpop.f32.mrb[12].mxu1 }
 0x167   : > { %v3207_v21 = vpop.f32.mrb[13].mxu1 }
 0x168   : > { %v3209_v22 = vpop.f32.mrb[14].mxu1 }
 0x169   : > { %v3211_v23 = vpop.f32.mrb[15].mxu1 }
 0x16f   : > { %v2384_v24 = vpop.f32.mrb[0].mxu0 }
 0x170   : > { %v2430_v26 = vadd.f32 %v2384_v24, %v2288_v8  ;;  %v1196_v27 = vpop.f32.mrb[1].mxu0 }
 0x171   : > { %v2431_v28 = vadd.f32 %v1196_v27, %v533_v9  ;;  %v2385_v29 = vpop.f32.mrb[2].mxu0 }
 0x172   : > { %v3219_v30 = vadd.f32 %v2430_v26, %v3216_v25  ;;  %v2432_v31 = vadd.f32 %v2385_v29, %v2289_v10  ;;  %v1199_v32 = vpop.f32.mrb[3].mxu0 }
 0x173   : > { %v3222_v33 = vadd.f32 %v2431_v28, %v3216_v25  ;;  %v2433_v34 = vadd.f32 %v1199_v32, %v536_v11 }
 0x174   : > { %v1396_v35 = vsub.f32 0.0, %v3219_v30  ;;  %v3226_v36 = vadd.f32 %v2432_v31, %v3216_v25 }
 0x175   : > { %v1394_v37 = vsub.f32 0.0, %v3222_v33  ;;  %v3230_v38 = vadd.f32 %v2433_v34, %v3216_v25 }
 0x176   : > { %v1430_v39 = vmul.f32 1.442695, %v1396_v35  ;;  %v1397_v40 = vsub.f32 0.0, %v3226_v36 }
 0x177   : > { %v1426_v41 = vmul.f32 1.442695, %v1394_v37  ;;  %v1395_v42 = vsub.f32 0.0, %v3230_v38  ;;  %v2388_v43 = vpop.f32.mrb[4].mxu0 }
 0x178   : > { %2646 = vpow2.f32 %v1430_v39  ;;  %v1432_v44 = vmul.f32 1.442695, %v1397_v40  ;;  %v2434_v45 = vadd.f32 %v2388_v43, %v2292_v12  ;;  %v1212_v46 = vpop.f32.mrb[5].mxu0 }
 0x179   : > { %2648 = vpow2.f32 %v1426_v41  ;;  %v1428_v47 = vmul.f32 1.442695, %v1395_v42  ;;  %v2435_v48 = vadd.f32 %v1212_v46, %v549_v13  ;;  %v2389_v49 = vpop.f32.mrb[6].mxu0 }
 0x17a   : > { %2650 = vpow2.f32 %v1432_v44  ;;  %v3235_v50 = vadd.f32 %v2434_v45, %v3216_v25  ;;  %v2436_v51 = vadd.f32 %v2389_v49, %v2293_v14  ;;  %v1215_v52 = vpop.f32.mrb[7].mxu0 }
 0x17b   : > { %2652 = vpow2.f32 %v1428_v47  ;;  %v3238_v53 = vadd.f32 %v2435_v48, %v3216_v25  ;;  %v2437_v54 = vadd.f32 %v1215_v52, %v552_v15 }
 0x17c   : > { %v1400_v55 = vsub.f32 0.0, %v3235_v50  ;;  %v3242_v56 = vadd.f32 %v2436_v51, %v3216_v25 }
 0x17d   : > { %v1398_v57 = vsub.f32 0.0, %v3238_v53  ;;  %v3246_v58 = vadd.f32 %v2437_v54, %v3216_v25 }
 0x17e   : > { %v1438_v59 = vmul.f32 1.442695, %v1400_v55  ;;  %v1401_v60 = vsub.f32 0.0, %v3242_v56 }
 0x17f   : > { %v1434_v61 = vmul.f32 1.442695, %v1398_v57  ;;  %v1399_v62 = vsub.f32 0.0, %v3246_v58  ;;  %v2392_v63 = vpop.f32.mrb[8].mxu0 }
 0x180   : > { %2654 = vpow2.f32 %v1438_v59  ;;  %v1440_v0 = vmul.f32 1.442695, %v1401_v60  ;;  %v2438_v1 = vadd.f32 %v2392_v63, %v2296_v16  ;;  %v1228_v2 = vpop.f32.mrb[9].mxu0 }
 0x181   : > { %2656 = vpow2.f32 %v1434_v61  ;;  %v1436_v3 = vmul.f32 1.442695, %v1399_v62  ;;  %v2439_v4 = vadd.f32 %v1228_v2, %v565_v17  ;;  %v2393_v5 = vpop.f32.mrb[10].mxu0 }
 0x182   : > { %v2647_v6 = vpop.eup %2646  ;;  %2658 = vpow2.f32 %v1440_v0  ;;  %v3251_v7 = vadd.f32 %v2438_v1, %v3216_v25  ;;  %v2440_v8 = vadd.f32 %v2393_v5, %v2297_v18  ;;  %v1231_v9 = vpop.f32.mrb[11].mxu0 }
 0x183   : > { %v2649_v10 = vpop.eup %2648  ;;  %v1492_v11 = vadd.f32 1.0, %v2647_v6  ;;  %2660 = vpow2.f32 %v1436_v3  ;;  %v3254_v12 = vadd.f32 %v2439_v4, %v3216_v25  ;;  %v2441_v13 = vadd.f32 %v1231_v9, %v3203_v19 }
 0x184   : > { %v2651_v14 = vpop.eup %2650  ;;  %v1490_v15 = vadd.f32 1.0, %v2649_v10  ;;  %v1404_v16 = vsub.f32 0.0, %v3251_v7  ;;  %v3259_v17 = vadd.f32 %v2440_v8, %v3216_v25 }
 0x185   : > { %v2653_v24 = vpop.eup %2652  ;;  %2662 = vrcp.f32 %v1492_v11  ;;  %v1493_v26 = vadd.f32 1.0, %v2651_v14  ;;  %v1402_v18 = vsub.f32 0.0, %v3254_v12  ;;  %v3263_v27 = vadd.f32 %v2441_v13, %v3216_v25 }
 0x186   : > { %2664 = vrcp.f32 %v1490_v15  ;;  %v1491_v28 = vadd.f32 1.0, %v2653_v24  ;;  %v1446_v29 = vmul.f32 1.442695, %v1404_v16  ;;  %v1405_v19 = vsub.f32 0.0, %v3259_v17 }
 0x187   : > { %2666 = vrcp.f32 %v1493_v26  ;;  %v1442_v31 = vmul.f32 1.442695, %v1402_v18  ;;  %v1403_v32 = vsub.f32 0.0, %v3263_v27  ;;  %v2396_v34 = vpop.f32.mrb[12].mxu0 }
 0x188   : > { %2668 = vrcp.f32 %v1491_v28  ;;  %v1448_v35 = vmul.f32 1.442695, %v1405_v19  ;;  %v2442_v37 = vadd.f32 %v2396_v34, %v3205_v20  ;;  %v1244_v39 = vpop.f32.mrb[13].mxu0 }
 0x189   : > { %2670 = vpow2.f32 %v1446_v29  ;;  %v1444_v40 = vmul.f32 1.442695, %v1403_v32  ;;  %v2443_v41 = vadd.f32 %v1244_v39, %v3207_v21  ;;  %v2397_v42 = vpop.f32.mrb[14].mxu0 }
 0x18a   : > { %v2655_v43 = vpop.eup %2654  ;;  %2672 = vpow2.f32 %v1442_v31  ;;  %v3270_v44 = vadd.f32 %v2442_v37, %v3216_v25  ;;  %v2444_v45 = vadd.f32 %v2397_v42, %v3209_v22  ;;  %v1247_v46 = vpop.f32.mrb[15].mxu0 }
 0x18b   : > { %v2657_v47 = vpop.eup %2656  ;;  %v1496_v48 = vadd.f32 1.0, %v2655_v43  ;;  %2674 = vpow2.f32 %v1448_v35  ;;  %v3274_v49 = vadd.f32 %v2443_v41, %v3216_v25  ;;  %v2445_v20 = vadd.f32 %v1247_v46, %v3211_v23 }
 0x18c   : > { %v2659_v51 = vpop.eup %2658  ;;  %v1494_v52 = vadd.f32 1.0, %v2657_v47  ;;  %2676 = vpow2.f32 %v1444_v40  ;;  %v1408_v21 = vsub.f32 0.0, %v3270_v44  ;;  %v3279_v54 = vadd.f32 %v2444_v45, %v3216_v25 }
 0x18d   : > { %v2661_v55 = vpop.eup %2660  ;;  %2678 = vrcp.f32 %v1496_v48  ;;  %v1497_v22 = vadd.f32 1.0, %v2659_v51  ;;  %v1406_v57 = vsub.f32 0.0, %v3274_v49  ;;  %v3283_v59 = vadd.f32 %v2445_v20, %v3216_v25 }
 0x18e   : > { %2680 = vrcp.f32 %v1494_v52  ;;  %v1495_v60 = vadd.f32 1.0, %v2661_v55  ;;  %v1454_v23 = vmul.f32 1.442695, %v1408_v21  ;;  %v1409_v61 = vsub.f32 0.0, %v3279_v54  ;;  %v2352_v62 = vpop.f32.mrb[16].mxu1 }
 0x18f   : > { %v2663_v63 = vpop.eup %2662  ;;  %2682 = vrcp.f32 %v1497_v22  ;;  %v1450_v0 = vmul.f32 1.442695, %v1406_v57  ;;  %v1407_v1 = vsub.f32 0.0, %v3283_v59  ;;  %v2400_v2 = vpop.f32.mrb[16].mxu0 }
 0x190   : > { %v902_v3 = vpop.f32.mrb[17].mxu1  ;;  %v2665_v4 = vpop.eup %2664  ;;  %v1556_v5 = vmul.f32 %v2663_v63, %v3219_v30  ;;  %2684 = vrcp.f32 %v1495_v60  ;;  %v1456_v6 = vmul.f32 1.442695, %v1409_v61  ;;  %v2446_v8 = vadd.f32 %v2400_v2, %v2352_v62 }
 0x191   : > { %v1260_v9 = vpop.f32.mrb[17].mxu0  ;;  %v2353_v10 = vpop.f32.mrb[18].mxu1  ;;  %v1554_v13 = vmul.f32 %v2665_v4, %v3222_v33  ;;  %2686 = vpow2.f32 %v1454_v23  ;;  %v1452_v14 = vmul.f32 1.442695, %v1407_v1 }
 0x192   : > { %v2667_v11 = vpop.eup %2666  ;;  %v2447_v15 = vadd.f32 %v1260_v9, %v902_v3  ;;  %v2401_v16 = vpop.f32.mrb[18].mxu0  ;;  %2688 = vpow2.f32 %v1450_v0  ;;  %v3292_v30 = vadd.f32 %v2446_v8, %v3216_v25 }
 0x193   : > { %v905_v24 = vpop.f32.mrb[19].mxu1  ;;  %v2669_v26 = vpop.eup %2668  ;;  %v1557_v18 = vmul.f32 %v2667_v11, %v3226_v36  ;;  %v2448_v28 = vadd.f32 %v2401_v16, %v2353_v10  ;;  %2690 = vpow2.f32 %v1456_v6 }
 0x194   : > { %v1263_v29 = vpop.f32.mrb[19].mxu0  ;;  %v2671_v19 = vpop.eup %2670  ;;  %v1555_v31 = vmul.f32 %v2669_v26, %v3230_v38  ;;  %v3296_v33 = vadd.f32 %v2447_v15, %v3216_v25  ;;  %2692 = vpow2.f32 %v1452_v14  ;;  %v1412_v36 = vsub.f32 0.0, %v3292_v30 }
 0x195   : > { %v2449_v32 = vadd.f32 %v1263_v29, %v905_v24  ;;  %v2673_v34 = vpop.eup %2672  ;;  %v2111_v35 = vpack.c.bf16 %v1557_v18, %v1556_v5  ;;  %v1500_v37 = vadd.f32 1.0, %v2671_v19  ;;  %v3301_v43 = vadd.f32 %v2448_v28, %v3216_v25 }
 0x196   : > { %v2675_v39 = vpop.eup %2674  ;;  %v2106_v40 = vpack.c.bf16 %v1555_v31, %v1554_v13  ;;  %v1498_v41 = vadd.f32 1.0, %v2673_v34  ;;  %v1410_v42 = vsub.f32 0.0, %v3296_v33  ;;  %v1462_v46 = vmul.f32 1.442695, %v1412_v36  ;;  %v2356_v48 = vpop.f32.mrb[20].mxu1 }
 0x197   : > { %v2677_v38 = vpop.eup %2676  ;;  %2183 = vst [vmem:[%s3305_s10 + $0x8] sm:$0xff] %v2111_v35   ;;  %2694 = vrcp.f32 %v1500_v37  ;;  %v1501_v45 = vadd.f32 1.0, %v2675_v39  ;;  %v3309_v47 = vadd.f32 %v2449_v32, %v3216_v25  ;;  %v1413_v21 = vsub.f32 0.0, %v3301_v43  ;;  %v2404_v55 = vpop.f32.mrb[20].mxu0 }
 0x198   : > { %v2679_v20 = vpop.eup %2678  ;;  %2107 = vst [vmem:[%s3305_s10] sm:$0xff] %v2106_v40   ;;  %2696 = vrcp.f32 %v1498_v41  ;;  %v1499_v51 = vadd.f32 1.0, %v2677_v38  ;;  %v1458_v52 = vmul.f32 1.442695, %v1410_v42  ;;  %v918_v22 = vpop.f32.mrb[21].mxu1  ;;  %v2450_v61 = vadd.f32 %v2404_v55, %v2356_v48 }
 0x199   : > { %v2681_v57 = vpop.eup %2680  ;;  %v1560_v60 = vmul.f32 %v2679_v20, %v3235_v50  ;;  %2698 = vrcp.f32 %v1501_v45  ;;  %v1411_v23 = vsub.f32 0.0, %v3309_v47  ;;  %v1276_v62 = vpop.f32.mrb[21].mxu0  ;;  %v1464_v2 = vmul.f32 1.442695, %v1413_v21 }
 0x19a   : > { %v2357_v63 = vpop.f32.mrb[22].mxu1  ;;  %v2683_v0 = vpop.eup %2682  ;;  %v1558_v1 = vmul.f32 %v2681_v57, %v3238_v53  ;;  %2700 = vrcp.f32 %v1499_v51  ;;  %v2451_v3 = vadd.f32 %v1276_v62, %v918_v22  ;;  %v3318_v50 = vadd.f32 %v2450_v61, %v3216_v25 }
 0x19b   : > { %v2405_v4 = vpop.f32.mrb[22].mxu0  ;;  %v921_v5 = vpop.f32.mrb[23].mxu1  ;;  %v1561_v8 = vmul.f32 %v2683_v0, %v3242_v56  ;;  %2702 = vpow2.f32 %v1462_v46  ;;  %v1460_v9 = vmul.f32 1.442695, %v1411_v23 }
 0x19c   : > { %v2685_v6 = vpop.eup %2684  ;;  %v1279_v10 = vpop.f32.mrb[23].mxu0  ;;  %2704 = vpow2.f32 %v1458_v52  ;;  %v3322_v53 = vadd.f32 %v2451_v3, %v3216_v25  ;;  %v2452_v14 = vadd.f32 %v2405_v4, %v2357_v63  ;;  %v1416_v56 = vsub.f32 0.0, %v3318_v50 }
 0x19d   : > { %v2687_v11 = vpop.eup %2686  ;;  %v1559_v13 = vmul.f32 %v2685_v6, %v3246_v58  ;;  %v2121_v16 = vpack.c.bf16 %v1561_v8, %v1560_v60  ;;  %2706 = vpow2.f32 %v1464_v2  ;;  %v2453_v36 = vadd.f32 %v1279_v10, %v921_v5 }
 0x19e   : > { %v2689_v15 = vpop.eup %2688  ;;  %v1504_v24 = vadd.f32 1.0, %v2687_v11  ;;  %2708 = vpow2.f32 %v1460_v9  ;;  %v1414_v29 = vsub.f32 0.0, %v3322_v53  ;;  %v1470_v31 = vmul.f32 1.442695, %v1416_v56  ;;  %v2360_v34 = vpop.f32.mrb[24].mxu1 }
 0x19f   : > { %v2691_v26 = vpop.eup %2690  ;;  %v2116_v18 = vpack.c.bf16 %v1559_v13, %v1558_v1  ;;  %v1502_v28 = vadd.f32 1.0, %v2689_v15  ;;  %2185 = vst [vmem:[%s3305_s10 + $0x18] sm:$0xff] %v2121_v16   ;;  %v3328_v32 = vadd.f32 %v2452_v14, %v3216_v25  ;;  %v2408_v39 = vpop.f32.mrb[24].mxu0  ;;  %v3334_v51 = vadd.f32 %v2453_v36, %v3216_v25 }
 0x1a0   : > { %v2693_v19 = vpop.eup %2692  ;;  %2710 = vrcp.f32 %v1504_v24  ;;  %v1505_v58 = vadd.f32 1.0, %v2691_v26  ;;  %v1466_v37 = vmul.f32 1.442695, %v1414_v29  ;;  %v934_v40 = vpop.f32.mrb[25].mxu1  ;;  %v2454_v38 = vadd.f32 %v2408_v39, %v2360_v34 }
 0x1a1   : > { %2184 = vst [vmem:[%s3305_s10 + $0x10] sm:$0xff] %v2116_v18   ;;  %2712 = vrcp.f32 %v1502_v28  ;;  %v1503_v35 = vadd.f32 1.0, %v2693_v19  ;;  %v2695_v41 = vpop.eup %2694  ;;  %v1417_v42 = vsub.f32 0.0, %v3328_v32  ;;  %v1292_v45 = vpop.f32.mrb[25].mxu0 }
 0x1a2   : > { %2714 = vrcp.f32 %v1505_v58  ;;  %v2361_v46 = vpop.f32.mrb[26].mxu1  ;;  %v2697_v48 = vpop.eup %2696  ;;  %v1564_v20 = vmul.f32 %v2695_v41, %v3251_v7  ;;  %v2455_v52 = vadd.f32 %v1292_v45, %v934_v40  ;;  %v3338_v23 = vadd.f32 %v2454_v38, %v3216_v25 }
 0x1a3   : > { %2716 = vrcp.f32 %v1503_v35  ;;  %v2409_v21 = vpop.f32.mrb[26].mxu0  ;;  %v937_v55 = vpop.f32.mrb[27].mxu1  ;;  %v1562_v57 = vmul.f32 %v2697_v48, %v3254_v12  ;;  %v1472_v60 = vmul.f32 1.442695, %v1417_v42  ;;  %v1415_v7 = vsub.f32 0.0, %v3334_v51 }
 0x1a4   : > { %v2699_v22 = vpop.eup %2698  ;;  %2718 = vpow2.f32 %v1470_v31  ;;  %v1295_v61 = vpop.f32.mrb[27].mxu0  ;;  %v3343_v0 = vadd.f32 %v2455_v52, %v3216_v25  ;;  %v1420_v12 = vsub.f32 0.0, %v3338_v23  ;;  %v2456_v3 = vadd.f32 %v2409_v21, %v2361_v46 }
 0x1a5   : > { %v2701_v62 = vpop.eup %2700  ;;  %v1565_v63 = vmul.f32 %v2699_v22, %v3259_v17  ;;  %2720 = vpow2.f32 %v1466_v37  ;;  %v1468_v8 = vmul.f32 1.442695, %v1415_v7  ;;  %v2457_v56 = vadd.f32 %v1295_v61, %v937_v55 }
 0x1a6   : > { %v2703_v1 = vpop.eup %2702  ;;  %v1563_v2 = vmul.f32 %v2701_v62, %v3263_v27  ;;  %2722 = vpow2.f32 %v1472_v60  ;;  %v1418_v17 = vsub.f32 0.0, %v3343_v0  ;;  %v1478_v13 = vmul.f32 1.442695, %v1420_v12  ;;  %v2364_v27 = vpop.f32.mrb[28].mxu1 }
 0x1a7   : > { %v2705_v4 = vpop.eup %2704  ;;  %v2131_v5 = vpack.c.bf16 %v1565_v63, %v1564_v20  ;;  %v1508_v6 = vadd.f32 1.0, %v2703_v1  ;;  %v3349_v14 = vadd.f32 %v2456_v3, %v3216_v25  ;;  %v2412_v26 = vpop.f32.mrb[28].mxu0  ;;  %v3356_v36 = vadd.f32 %v2457_v56, %v3216_v25 }
 0x1a8   : > { %v2707_v9 = vpop.eup %2706  ;;  %v2126_v10 = vpack.c.bf16 %v1563_v2, %v1562_v57  ;;  %v1506_v11 = vadd.f32 1.0, %v2705_v4  ;;  %v1474_v24 = vmul.f32 1.442695, %v1418_v17  ;;  %v950_v18 = vpop.f32.mrb[29].mxu1  ;;  %v2458_v58 = vadd.f32 %v2412_v26, %v2364_v27 }
 0x1a9   : > { %v2709_v15 = vpop.eup %2708  ;;  %2187 = vst [vmem:[%s3305_s10 + $0x28] sm:$0xff] %v2131_v5   ;;  %2724 = vrcp.f32 %v1508_v6  ;;  %v1509_v16 = vadd.f32 1.0, %v2707_v9  ;;  %v1421_v19 = vsub.f32 0.0, %v3349_v14  ;;  %v1308_v31 = vpop.f32.mrb[29].mxu0 }
 0x1aa   : > { %v2711_v28 = vpop.eup %2710  ;;  %2186 = vst [vmem:[%s3305_s10 + $0x20] sm:$0xff] %v2126_v10   ;;  %2726 = vrcp.f32 %v1506_v11  ;;  %v1507_v29 = vadd.f32 1.0, %v2709_v15  ;;  %v2365_v34 = vpop.f32.mrb[30].mxu1  ;;  %v2459_v39 = vadd.f32 %v1308_v31, %v950_v18  ;;  %v3360_v46 = vadd.f32 %v2458_v58, %v3216_v25 }
 0x1ab   : > { %v2713_v35 = vpop.eup %2712  ;;  %v1568_v37 = vmul.f32 %v2711_v28, %v3270_v44  ;;  %2728 = vrcp.f32 %v1509_v16  ;;  %v2413_v40 = vpop.f32.mrb[30].mxu0  ;;  %v1480_v45 = vmul.f32 1.442695, %v1421_v19  ;;  %v1419_v44 = vsub.f32 0.0, %v3356_v36 }
 0x1ac   : > { %v953_v41 = vpop.f32.mrb[31].mxu1  ;;  %v2715_v42 = vpop.eup %2714  ;;  %v1566_v38 = vmul.f32 %v2713_v35, %v3274_v49  ;;  %2730 = vrcp.f32 %v1507_v29  ;;  %v3365_v21 = vadd.f32 %v2459_v39, %v3216_v25  ;;  %v1424_v49 = vsub.f32 0.0, %v3360_v46 }
 0x1ad   : > { %v1311_v48 = vpop.f32.mrb[31].mxu0  ;;  %v2717_v20 = vpop.eup %2716  ;;  %v1569_v52 = vmul.f32 %v2715_v42, %v3279_v54  ;;  %2732 = vpow2.f32 %v1468_v8  ;;  %v2460_v57 = vadd.f32 %v2413_v40, %v2365_v34  ;;  %v1476_v7 = vmul.f32 1.442695, %v1419_v44 }
 0x1ae   : > { %v2719_v55 = vpop.eup %2718  ;;  %v1567_v22 = vmul.f32 %v2717_v20, %v3283_v59  ;;  %2734 = vpow2.f32 %v1478_v13  ;;  %v1486_v1 = vmul.f32 1.442695, %v1424_v49  ;;  %v1422_v12 = vsub.f32 0.0, %v3365_v21 }
 0x1af   : > { %v2721_v60 = vpop.eup %2720  ;;  %v2141_v61 = vpack.c.bf16 %v1569_v52, %v1568_v37  ;;  %v1512_v62 = vadd.f32 1.0, %v2719_v55  ;;  %2736 = vpow2.f32 %v1474_v24  ;;  %v3372_v59 = vadd.f32 %v2460_v57, %v3216_v25 }
 0x1b0   : > { %v2723_v54 = vpop.eup %2722  ;;  %v2136_v63 = vpack.c.bf16 %v1567_v22, %v1566_v38  ;;  %2738 = vpow2.f32 %v1480_v45  ;;  %v1510_v3 = vadd.f32 1.0, %v2721_v60  ;;  %v2461_v4 = vadd.f32 %v1311_v48, %v953_v41 }
 0x1b1   : > { %2189 = vst [vmem:[%s3305_s10 + $0x38] sm:$0xff] %v2141_v61   ;;  %2740 = vrcp.f32 %v1512_v62  ;;  %v1513_v2 = vadd.f32 1.0, %v2723_v54  ;;  %v1425_v6 = vsub.f32 0.0, %v3372_v59  ;;  %v1482_v17 = vmul.f32 1.442695, %v1422_v12 }
 0x1b2   : > { %2188 = vst [vmem:[%s3305_s10 + $0x30] sm:$0xff] %v2136_v63   ;;  %v3377_v9 = vadd.f32 %v2461_v4, %v3216_v25 }
 0x1b3   : > { %v2725_v5 = vpop.eup %2724  ;;  %2742 = vrcp.f32 %v1513_v2  ;;  %v1488_v11 = vmul.f32 1.442695, %v1425_v6 }
 0x1b4   : > { %v2727_v8 = vpop.eup %2726  ;;  %2744 = vpow2.f32 %v1476_v7  ;;  %v1572_v27 = vmul.f32 %v2725_v5, %v3292_v30  ;;  %v1423_v16 = vsub.f32 0.0, %v3377_v9 }
 0x1b5   : > { %v2729_v10 = vpop.eup %2728  ;;  %2746 = vpow2.f32 %v1486_v1  ;;  %v1570_v56 = vmul.f32 %v2727_v8, %v3296_v33 }
 0x1b6   : > { %v2731_v13 = vpop.eup %2730  ;;  %v1573_v15 = vmul.f32 %v2729_v10, %v3301_v43  ;;  %2748 = vrcp.f32 %v1510_v3  ;;  %v1484_v43 = vmul.f32 1.442695, %v1423_v16 }
 0x1b7   : > { %v2733_v24 = vpop.eup %2732  ;;  %v1571_v26 = vmul.f32 %v2731_v13, %v3309_v47  ;;  %2750 = vpow2.f32 %v1488_v11 }
 0x1b8   : > { %v2735_v25 = vpop.eup %2734  ;;  %v2151_v18 = vpack.c.bf16 %v1573_v15, %v1572_v27  ;;  %v1511_v28 = vadd.f32 1.0, %v2733_v24  ;;  %2752 = vpow2.f32 %v1482_v17 }
 0x1b9   : > { %v2737_v29 = vpop.eup %2736  ;;  %v2146_v19 = vpack.c.bf16 %v1571_v26, %v1570_v56  ;;  %v1516_v30 = vadd.f32 1.0, %v2735_v25 }
 0x1ba   : > { %v2739_v58 = vpop.eup %2738  ;;  %2191 = vst [vmem:[%s3305_s10 + $0x48] sm:$0xff] %v2151_v18   ;;  %2754 = vrcp.f32 %v1511_v28  ;;  %v1514_v34 = vadd.f32 1.0, %v2737_v29 }
 0x1bb   : > { %v2741_v31 = vpop.eup %2740  ;;  %2190 = vst [vmem:[%s3305_s10 + $0x40] sm:$0xff] %v2146_v19   ;;  %2756 = vrcp.f32 %v1516_v30  ;;  %v1517_v35 = vadd.f32 1.0, %v2739_v58 }
 0x1bc   : > { %v1576_v37 = vmul.f32 %v2741_v31, %v3318_v50 }
 0x1bd   : > { %v2743_v33 = vpop.eup %2742  ;;  %2758 = vrcp.f32 %v1517_v35 }
 0x1be   : > { %v2745_v47 = vpop.eup %2744  ;;  %v1577_v39 = vmul.f32 %v2743_v33, %v3328_v32  ;;  %2760 = vpow2.f32 %v1484_v43 }
 0x1bf   : > { %v2747_v40 = vpop.eup %2746  ;;  %2762 = vrcp.f32 %v1514_v34  ;;  %v1515_v41 = vadd.f32 1.0, %v2745_v47 }
 0x1c0   : > { %v2749_v42 = vpop.eup %2748  ;;  %v2161_v38 = vpack.c.bf16 %v1577_v39, %v1576_v37  ;;  %v1520_v45 = vadd.f32 1.0, %v2747_v40 }
 0x1c1   : > { %v2751_v48 = vpop.eup %2750  ;;  %2764 = vrcp.f32 %v1515_v41  ;;  %v1574_v50 = vmul.f32 %v2749_v42, %v3322_v53 }
 0x1c2   : > { %v2753_v20 = vpop.eup %2752  ;;  %2193 = vst [vmem:[%s3305_s10 + $0x58] sm:$0xff] %v2161_v38   ;;  %2766 = vrcp.f32 %v1520_v45  ;;  %v1521_v52 = vadd.f32 1.0, %v2751_v48 }
 0x1c3   : > { %v1518_v22 = vadd.f32 1.0, %v2753_v20 }
 0x1c4   : > { %v2755_v44 = vpop.eup %2754  ;;  %2768 = vrcp.f32 %v1521_v52 }
 0x1c5   : > { %v2757_v55 = vpop.eup %2756  ;;  %v1575_v32 = vmul.f32 %v2755_v44, %v3334_v51  ;;  %2770 = vrcp.f32 %v1518_v22 }
 0x1c6   : > { %v1580_v61 = vmul.f32 %v2757_v55, %v3338_v23 }
 0x1c7   : > { %v2759_v49 = vpop.eup %2758  ;;  %v2156_v57 = vpack.c.bf16 %v1575_v32, %v1574_v50 }
 0x1c8   : > { %v2761_v60 = vpop.eup %2760  ;;  %v1581_v62 = vmul.f32 %v2759_v49, %v3349_v14 }
 0x1c9   : > { %v2763_v54 = vpop.eup %2762  ;;  %2192 = vst [vmem:[%s3305_s10 + $0x50] sm:$0xff] %v2156_v57   ;;  %v1519_v63 = vadd.f32 1.0, %v2761_v60 }
 0x1ca   : > { %v2171_v7 = vpack.c.bf16 %v1581_v62, %v1580_v61  ;;  %v1578_v1 = vmul.f32 %v2763_v54, %v3343_v0 }
 0x1cb   : > { %v2765_v53 = vpop.eup %2764  ;;  %2772 = vrcp.f32 %v1519_v63 }
 0x1cc   : > { %v2767_v51 = vpop.eup %2766  ;;  %2195 = vst [vmem:[%s3305_s10 + $0x68] sm:$0xff] %v2171_v7   ;;  %v1579_v2 = vmul.f32 %v2765_v53, %v3356_v36 }
 0x1cd   : > { %v1584_v12 = vmul.f32 %v2767_v51, %v3360_v46 }
 0x1ce   : > { %v2769_v23 = vpop.eup %2768  ;;  %v2166_v14 = vpack.c.bf16 %v1579_v2, %v1578_v1 }
 0x1cf   : > { %v1585_v3 = vmul.f32 %v2769_v23, %v3372_v59  ;;  %v2771_v5 = vpop.eup %2770 }
 0x1d0   : > { %2194 = vst [vmem:[%s3305_s10 + $0x60] sm:$0xff] %v2166_v14   ;;  %v1582_v0 = vmul.f32 %v2771_v5, %v3365_v21 }
 0x1d1   : > { %v2181_v4 = vpack.c.bf16 %v1585_v3, %v1584_v12 }
 0x1d3   : > { %2197 = vst [vmem:[%s3305_s10 + $0x78] sm:$0xff] %v2181_v4  }
 0x1d5   : > { %v2773_v6 = vpop.eup %2772 }
 0x1d6   : > { %v1583_v36 = vmul.f32 %v2773_v6, %v3377_v9 }
 0x1d8   : > { %v2176_v46 = vpack.c.bf16 %v1583_v36, %v1582_v0 }
 0x1da   : > { %2196 = vst [vmem:[%s3305_s10 + $0x70] sm:$0xff] %v2176_v46  }
 0x1db   : > { %2845 = shalt.err (!%p2842_p5)
}
 0x1dc   : > { %s2846_s26 = scalar_lea.hbm %s3408_s19, 2048  ;;  %s2850_s20 = scalar_lea.hbm %s3463_s3, 4096 }
 0x1dd   : > { %p2847_p9 = scmp.ne.s32.totalorder %s3408_s19, %s2846_s26  ;;  %p2851_p3 = scmp.lt.u32.totalorder %s3408_s19, %s3463_s3 }
 0x1de   : > { %p2852_p7 = scmp.lt.u32.totalorder %s2850_s20, %s2846_s26  ;;  %p2854_p4 = scmp.lt.u32.totalorder %s2846_s26, %s3408_s19 }
 0x1df   : > { %p2848_p1 = pnand %p2847_p9, %p3042_p10 }
 0x1e0   : > { %p2853_p11 = por %p2852_p7, %p2851_p3 }
 0x1e1   : > { %p2849_p2 = pneg %p2848_p1 }
 0x1e2   : > { %p2855_p6 = por %p2854_p4, %p2853_p11 }
 0x1e4   : > { %p2856_p8 = pnand %p2855_p6, %p2849_p2 }
 0x1e6   : > { %2859 = shalt.err (!%p2856_p8)
}
 0x1e7   : > { %s2925_s10 = smov 64   ;;  %s2926_s11 = smov 4  }
 0x1e8   : > { %2503 = dma.vmem_to_hbm [thread:$0]  (%p3042_p10), %s3410_s7, 2048, %s3408_s19, %s1747_s30, %s2925_s10, %s2925_s10, %s2926_s11  }
 0x1e9 PF: > { %s1779_s8 = sand.u32 1, %s2898_s12   ;;  %p3480_p12 = scmp.ne.s32.totalorder %s3471_s23, 0 }
 0x1ea   : > { %p3481_p13 = scmp.ge.s32.totalorder %s2918_s17, 2  ;;  %s1780_s18 = scalar_lea.sflag [#allocation4], %s1779_s8 }
 0x1ec   : > { %p2514_p0 = pnand %p3481_p13, %p3480_p12 }
 0x1ee   : > { %2893 = dma.done.wait (!%p2514_p0), %s1780_s18, 2048  }
 0x1ef   : > { %2895 = vsyncadd (!%p2514_p0), %s1780_s18, 4294965248  ;;  %s20_s17 = sadd.s32 1, %s2918_s17   ;;  %s3482_s12 = smov %s2902_s13 }
 0x1f0   : > { %p17_p5 = scmp.ge.s32.totalorder %s20_s17, 4   ;;  %s3483_s13 = smov %s2906_s14 }
 0x1f1   : > { %s3484_s14 = smov %s3051_s5  ;;  %s3485_s15 = smov %s2914_s16 }
 0x1f2   : > { %s3486_s16 = smov %s3488_s28  ;;  %19 = sbr.rel (!%p17_p5) target bundleno = 7 (0x7), region = 90 }
 0x1f9   :  { %1785 = vsyncpa [#allocation3], 1 }
 0x1fa   :  { %1787 = vsyncpa [#allocation3 + $0x1], 1 }
 0x1fb   :  { %1788 = vsyncpa [#allocation6], 1 }
 0x1fc   :  { %1789 = vsyncpa [#allocation4], 1 }
 0x1fd   :  { %1791 = vsyncpa [#allocation4 + $0x1], 1 }

</bundles_post_ra>
